<compile_context>
chip_gen: v5e
topology: v5e:2x2
jax: 0.10.0
libtpu: 0.0.40
codegen_flags: <defaults>
</compile_context>

<pallas_src>
import jax
import jax.numpy as jnp
from jax.experimental import pallas as pl
from jax.experimental.pallas import tpu as pltpu

# ---- hyperparameters from the PyTorch module --------------------------------
INPUT_POST = 10
INPUT_REPLY = 15
HIDDEN_LAYER_1 = (INPUT_REPLY + INPUT_POST) // 2  # 12
OUTPUT_SIZE = 2
BN_EPS = 1e-5

SELU_ALPHA = 1.6732632423543772848170429916717
SELU_SCALE = 1.0507009873554804934193349852946

TILE_B_MAX = 8192  # batch tile (lane axis); multiple of 128


def _round_up(x, m):
    return ((x + m - 1) // m) * m


# merged layer sizes
N1 = INPUT_POST + INPUT_REPLY   # 25
N2 = HIDDEN_LAYER_1             # 12
N3 = OUTPUT_SIZE                # 2

# 8-row-aligned offsets inside the packed parameter slab (rows = out-features,
# cols = in-features; biases stored as columns at col 0 of dedicated rows).
W1P_OFF = 0                                  # (N1, in_post)   rows 0..24
W1R_OFF = W1P_OFF + _round_up(N1, 8)         # (N1, in_reply)  rows 32..56
W2_OFF = W1R_OFF + _round_up(N1, 8)          # (N2, N1)        rows 64..75
W3_OFF = W2_OFF + _round_up(N2, 8)           # (N3, N2)        rows 80..81
B1_OFF = W3_OFF + _round_up(N3, 8)           # (N1, 1)         rows 88..112
B2_OFF = B1_OFF + _round_up(N1, 8)           # (N2, 1)         rows 120..131
B3_OFF = B2_OFF + _round_up(N2, 8)           # (N3, 1)         rows 136..137
SLAB_ROWS = B3_OFF + _round_up(N3, 8)        # 144


def _selu(x):
    # exp only on the (clamped) negative branch -> no overflow on the positive
    # branch even for extreme activations.
    neg = SELU_ALPHA * (jnp.exp(jnp.minimum(x, 0.0)) - 1.0)
    return SELU_SCALE * jnp.where(x > 0, x, neg)


# -----------------------------------------------------------------------------
# Kernel: one batch tile per grid step (transposed, lane-dense activations).
#   xp_ref : (in_post,  TILE_B)  post features, batch on the 128-lane axis
#   xr_ref : (in_reply, TILE_B)  reply features
#   w_ref  : (SLAB_ROWS, 128)    tile-aligned packed parameter slab (resident)
#   o_ref  : (OUTPUT_SIZE, TILE_B) log-probs (lane-dense stores)
# -----------------------------------------------------------------------------
def model00_kernel(xp_ref, xr_ref, w_ref, o_ref):
    in_post_dim = xp_ref.shape[0]
    in_reply_dim = xr_ref.shape[0]

    xp = xp_ref[...]                                    # (in_post,  T)
    xr = xr_ref[...]                                    # (in_reply, T)

    # 8-row / col-0 aligned slices -> zero-cost views (no relayout per step)
    w1p = w_ref[W1P_OFF:W1P_OFF + N1, 0:in_post_dim]    # (25, in_post)
    w1r = w_ref[W1R_OFF:W1R_OFF + N1, 0:in_reply_dim]   # (25, in_reply)
    w2 = w_ref[W2_OFF:W2_OFF + N2, 0:N1]                # (12, 25)
    w3 = w_ref[W3_OFF:W3_OFF + N3, 0:N2]                # (2, 12)
    b1 = w_ref[B1_OFF:B1_OFF + N1, 0:1]                 # (25, 1)
    b2 = w_ref[B2_OFF:B2_OFF + N2, 0:1]                 # (12, 1)
    b3 = w_ref[B3_OFF:B3_OFF + N3, 0:1]                 # (2, 1)

    # merged branch linear (block-diagonal over the two inputs, BN folded)
    h1 = _selu(jnp.dot(w1p, xp, preferred_element_type=jnp.float32)
               + jnp.dot(w1r, xr, preferred_element_type=jnp.float32) + b1)
    # hidden layer (AlphaDropout == identity in eval)
    h2 = _selu(jnp.dot(w2, h1, preferred_element_type=jnp.float32) + b2)
    # output linear
    logits = jnp.dot(w3, h2, preferred_element_type=jnp.float32) + b3  # (2, T)

    # 2-class log_softmax, one-exp closed form (purely elementwise, no
    # cross-lane reductions): lse = max(z0,z1) + log(1 + exp(-|z0-z1|))
    z0 = logits[0:1, :]
    z1 = logits[1:2, :]
    diff = z0 - z1
    lse = jnp.maximum(z0, z1) + jnp.log(1.0 + jnp.exp(-jnp.abs(diff)))
    o_ref[...] = logits - lse


# -----------------------------------------------------------------------------
# Wrapper-side parameter prep: fold BN, merge branches, pack one aligned slab.
# -----------------------------------------------------------------------------
def prepare_params(params):
    in_post_dim = params["w_post"].shape[0]
    in_reply_dim = params["w_reply"].shape[0]

    # fold eval-mode BatchNorm1d (affine=False) into the branch linears:
    #   ((x - mean) * s) @ W + b  ==  x @ (diag(s) W) + (b - (mean*s) @ W)
    s_p = jax.lax.rsqrt(params["post_var"] + BN_EPS)     # (1, in_post)
    s_r = jax.lax.rsqrt(params["reply_var"] + BN_EPS)    # (1, in_reply)
    wp = params["w_post"] * s_p.T                        # (in_post, 10)
    bp = params["b_post"] - (params["post_mean"] * s_p) @ params["w_post"]
    wr = params["w_reply"] * s_r.T                       # (in_reply, 15)
    br = params["b_reply"] - (params["reply_mean"] * s_r) @ params["w_reply"]

    cols = _round_up(max(in_post_dim, in_reply_dim, N1, N2, 1), 128)
    slab = jnp.zeros((SLAB_ROWS, cols), jnp.float32)

    # merged first layer, block-diagonal: out-features 0..9 <- post branch,
    # 10..24 <- reply branch (stored as (out, in) so the kernel does W @ x).
    slab = slab.at[W1P_OFF:W1P_OFF + INPUT_POST, 0:in_post_dim].set(wp.T)
    slab = slab.at[W1R_OFF + INPUT_POST:W1R_OFF + N1, 0:in_reply_dim].set(wr.T)
    slab = slab.at[W2_OFF:W2_OFF + N2, 0:N1].set(params["w_hl1"].T)
    slab = slab.at[W3_OFF:W3_OFF + N3, 0:N2].set(params["w_out"].T)
    # biases as columns at col 0 of 8-aligned row blocks
    slab = slab.at[B1_OFF:B1_OFF + INPUT_POST, 0].set(bp[0])
    slab = slab.at[B1_OFF + INPUT_POST:B1_OFF + N1, 0].set(br[0])
    slab = slab.at[B2_OFF:B2_OFF + N2, 0].set(params["b_hl1"][0])
    slab = slab.at[B3_OFF:B3_OFF + N3, 0].set(params["b_out"][0])
    return slab


def _choose_tile_b(batch):
    # Large batches: keep >= 2 grid steps so v7x's two TensorCores both get
    # work; otherwise one lane-aligned tile covering the whole batch.
    half = -(-batch // 2)
    return max(128, min(TILE_B_MAX, _round_up(half, 128)))


@jax.jit
def model00_forward(in_p, in_r, slab):
    B, in_post_dim = in_p.shape
    in_reply_dim = in_r.shape[1]

    # transposed, lane-dense layout (batch on the 128-lane axis); no concat,
    # no pad — the last grid block may be partial (padded lanes are never
    # written back and batch columns are independent through every op).
    xp_t = in_p.astype(jnp.float32).T                     # (in_post,  B)
    xr_t = in_r.astype(jnp.float32).T                     # (in_reply, B)

    tile_b = _choose_tile_b(B)
    grid = (pl.cdiv(B, tile_b),)

    out_t = pl.pallas_call(
        model00_kernel,
        out_shape=jax.ShapeDtypeStruct((OUTPUT_SIZE, B), jnp.float32),
        grid_spec=pltpu.PrefetchScalarGridSpec(
            num_scalar_prefetch=0,
            grid=grid,
            in_specs=[
                pl.BlockSpec((in_post_dim, tile_b), lambda i: (0, i)),
                pl.BlockSpec((in_reply_dim, tile_b), lambda i: (0, i)),
                pl.BlockSpec(slab.shape, lambda i: (0, 0)),   # resident slab
            ],
            out_specs=pl.BlockSpec((OUTPUT_SIZE, tile_b), lambda i: (0, i)),
        ),
        compiler_params=pltpu.CompilerParams(
            dimension_semantics=("parallel",),
            vmem_limit_bytes=32 * 1024 * 1024,
        ),
    )(xp_t, xr_t, slab)

    return out_t.T                                        # (B, 2)


# -----------------------------------------------------------------------------
# Parameter init (mirrors the module's shapes; weights stored (fan_in, fan_out))
# -----------------------------------------------------------------------------
def init_params(key, in_post, in_reply):
    ks = jax.random.split(key, 8)

    def kaiming(k, fan_in, fan_out):
        std = (2.0 / fan_in) ** 0.5
        return std * jax.random.normal(k, (fan_in, fan_out), jnp.float32)

    def bias(k, fan_in, n):
        bound = 1.0 / (fan_in ** 0.5)
        return jax.random.uniform(k, (1, n), jnp.float32, -bound, bound)

    return {
        # fresh BatchNorm1d running stats (eval mode)
        "post_mean": jnp.zeros((1, in_post), jnp.float32),
        "post_var": jnp.ones((1, in_post), jnp.float32),
        "reply_mean": jnp.zeros((1, in_reply), jnp.float32),
        "reply_var": jnp.ones((1, in_reply), jnp.float32),
        # branch linears
        "w_post": kaiming(ks[0], in_post, INPUT_POST),
        "b_post": bias(ks[1], in_post, INPUT_POST),
        "w_reply": kaiming(ks[2], in_reply, INPUT_REPLY),
        "b_reply": bias(ks[3], in_reply, INPUT_REPLY),
        # hidden layer
        "w_hl1": kaiming(ks[4], INPUT_POST + INPUT_REPLY, HIDDEN_LAYER_1),
        "b_hl1": bias(ks[5], INPUT_POST + INPUT_REPLY, HIDDEN_LAYER_1),
        # output layer
        "w_out": kaiming(ks[6], HIDDEN_LAYER_1, OUTPUT_SIZE),
        "b_out": bias(ks[7], HIDDEN_LAYER_1, OUTPUT_SIZE),
    }


def reference_forward(in_p, in_r, params):
    """Pure-JAX reference with the original (unfused) structure."""
    p = (in_p - params["post_mean"]) * jax.lax.rsqrt(params["post_var"] + BN_EPS)
    r = (in_r - params["reply_mean"]) * jax.lax.rsqrt(params["reply_var"] + BN_EPS)
    p = _selu(p @ params["w_post"] + params["b_post"])
    r = _selu(r @ params["w_reply"] + params["b_reply"])
    h = _selu(jnp.concatenate([p, r], axis=1) @ params["w_hl1"] + params["b_hl1"])
    logits = h @ params["w_out"] + params["b_out"]
    return jax.nn.log_softmax(logits, axis=1)


if __name__ == "__main__":
    IN_POST, IN_REPLY = 16, 24

    key = jax.random.PRNGKey(0)
    k_p, k_r, k_w = jax.random.split(key, 3)
    params = init_params(k_w, IN_POST, IN_REPLY)
    slab = prepare_params(params)

    # small batch: single (partial) grid step
    B1 = 8
    in_p = jax.random.normal(k_p, (B1, IN_POST), jnp.float32)
    in_r = jax.random.normal(k_r, (B1, IN_REPLY), jnp.float32)
    out = jax.block_until_ready(model00_forward(in_p, in_r, slab))
    ref = reference_forward(in_p, in_r, params)
    assert out.shape == (B1, OUTPUT_SIZE)
    assert jnp.allclose(out, ref, atol=1e-5, rtol=1e-5), "mismatch vs reference (B=8)"
    assert jnp.allclose(jnp.sum(jnp.exp(out), axis=1), 1.0, atol=1e-5)

    # larger batch: exercises the multi-step grid and the partial last block
    B2 = 300
    in_p2 = jax.random.normal(jax.random.PRNGKey(1), (B2, IN_POST), jnp.float32)
    in_r2 = jax.random.normal(jax.random.PRNGKey(2), (B2, IN_REPLY), jnp.float32)
    out2 = jax.block_until_ready(model00_forward(in_p2, in_r2, slab))
    ref2 = reference_forward(in_p2, in_r2, params)
    assert out2.shape == (B2, OUTPUT_SIZE)
    assert jnp.allclose(out2, ref2, atol=1e-5, rtol=1e-5), "mismatch vs reference (B=300)"
    assert jnp.allclose(jnp.sum(jnp.exp(out2), axis=1), 1.0, atol=1e-5)

    print("KERNEL_OK")
</pallas_src>

<mosaic_0001>
module attributes {stable_mosaic.version = 11 : i64} {
  func.func @model00_kernel(%arg0: i32, %arg1: memref<16x128xf32, #tpu.memory_space<vmem>>, %arg2: memref<24x128xf32, #tpu.memory_space<vmem>>, %arg3: memref<144x128xf32, #tpu.memory_space<vmem>>, %arg4: memref<2x128xf32, #tpu.memory_space<vmem>>) attributes {dimension_semantics = [#tpu.dimension_semantics<parallel>], iteration_bounds = array<i64: 1>, scalar_prefetch = 0 : i64, scratch_operands = 0 : i64, tpu.core_type = #tpu.core_type<tc>, window_params = [{transform_indices = @transform_0, window_bounds = array<i64: 16, 128>}, {transform_indices = @transform_1, window_bounds = array<i64: 24, 128>}, {pipeline_mode = #tpu.pipeline_mode<synchronous>, transform_indices = @transform_2, window_bounds = array<i64: 144, 128>}, {transform_indices = @transform_3, window_bounds = array<i64: 2, 128>}]} {
    %c0 = arith.constant 0 : index
    %c0_0 = arith.constant 0 : index
    %0 = vector.load %arg1[%c0, %c0_0] : memref<16x128xf32, #tpu.memory_space<vmem>>, vector<16x128xf32>
    %c0_1 = arith.constant 0 : index
    %c0_2 = arith.constant 0 : index
    %1 = vector.load %arg2[%c0_1, %c0_2] : memref<24x128xf32, #tpu.memory_space<vmem>>, vector<24x128xf32>
    %c0_3 = arith.constant 0 : index
    %c0_4 = arith.constant 0 : index
    %2 = vector.load %arg3[%c0_3, %c0_4] : memref<144x128xf32, #tpu.memory_space<vmem>>, vector<25x16xf32>
    %c32 = arith.constant 32 : index
    %c0_5 = arith.constant 0 : index
    %3 = vector.load %arg3[%c32, %c0_5] : memref<144x128xf32, #tpu.memory_space<vmem>>, vector<25x24xf32>
    %c64 = arith.constant 64 : index
    %c0_6 = arith.constant 0 : index
    %4 = vector.load %arg3[%c64, %c0_6] : memref<144x128xf32, #tpu.memory_space<vmem>>, vector<12x25xf32>
    %c80 = arith.constant 80 : index
    %c0_7 = arith.constant 0 : index
    %5 = vector.load %arg3[%c80, %c0_7] : memref<144x128xf32, #tpu.memory_space<vmem>>, vector<2x12xf32>
    %c88 = arith.constant 88 : index
    %c0_8 = arith.constant 0 : index
    %6 = vector.load %arg3[%c88, %c0_8] : memref<144x128xf32, #tpu.memory_space<vmem>>, vector<25x1xf32>
    %c120 = arith.constant 120 : index
    %c0_9 = arith.constant 0 : index
    %7 = vector.load %arg3[%c120, %c0_9] : memref<144x128xf32, #tpu.memory_space<vmem>>, vector<12x1xf32>
    %c136 = arith.constant 136 : index
    %c0_10 = arith.constant 0 : index
    %8 = vector.load %arg3[%c136, %c0_10] : memref<144x128xf32, #tpu.memory_space<vmem>>, vector<2x1xf32>
    %cst = arith.constant dense<0.000000e+00> : vector<25x128xf32>
    %9 = tpu.matmul %2, %0, %cst {dimension_numbers = #tpu.dot_dimension_numbers<[1], [0], [0], [1], [0, 0, 1, 1], [], []>} : vector<25x16xf32>, vector<16x128xf32>, vector<25x128xf32> -> vector<25x128xf32>
    %cst_11 = arith.constant dense<0.000000e+00> : vector<25x128xf32>
    %10 = tpu.matmul %3, %1, %cst_11 {dimension_numbers = #tpu.dot_dimension_numbers<[1], [0], [0], [1], [0, 0, 1, 1], [], []>} : vector<25x24xf32>, vector<24x128xf32>, vector<25x128xf32> -> vector<25x128xf32>
    %11 = arith.addf %9, %10 : vector<25x128xf32>
    %12 = vector.broadcast %6 : vector<25x1xf32> to vector<25x128xf32>
    %13 = arith.addf %11, %12 : vector<25x128xf32>
    %cst_12 = arith.constant 0.000000e+00 : f32
    %14 = vector.broadcast %cst_12 : f32 to vector<25x128xf32>
    %15 = arith.minimumf %13, %14 : vector<25x128xf32>
    %16 = math.exp %15 : vector<25x128xf32>
    %cst_13 = arith.constant 1.000000e+00 : f32
    %17 = vector.broadcast %cst_13 : f32 to vector<25x128xf32>
    %18 = arith.subf %16, %17 : vector<25x128xf32>
    %cst_14 = arith.constant 1.67326319 : f32
    %19 = vector.broadcast %cst_14 : f32 to vector<25x128xf32>
    %20 = arith.mulf %19, %18 : vector<25x128xf32>
    %cst_15 = arith.constant 0.000000e+00 : f32
    %21 = vector.broadcast %cst_15 : f32 to vector<25x128xf32>
    %22 = arith.cmpf ogt, %13, %21 : vector<25x128xf32>
    %23 = arith.select %22, %13, %20 : vector<25x128xi1>, vector<25x128xf32>
    %cst_16 = arith.constant 1.05070102 : f32
    %24 = vector.broadcast %cst_16 : f32 to vector<25x128xf32>
    %25 = arith.mulf %24, %23 : vector<25x128xf32>
    %cst_17 = arith.constant dense<0.000000e+00> : vector<12x128xf32>
    %26 = tpu.matmul %4, %25, %cst_17 {dimension_numbers = #tpu.dot_dimension_numbers<[1], [0], [0], [1], [0, 0, 1, 1], [], []>} : vector<12x25xf32>, vector<25x128xf32>, vector<12x128xf32> -> vector<12x128xf32>
    %27 = vector.broadcast %7 : vector<12x1xf32> to vector<12x128xf32>
    %28 = arith.addf %26, %27 : vector<12x128xf32>
    %cst_18 = arith.constant 0.000000e+00 : f32
    %29 = vector.broadcast %cst_18 : f32 to vector<12x128xf32>
    %30 = arith.minimumf %28, %29 : vector<12x128xf32>
    %31 = math.exp %30 : vector<12x128xf32>
    %cst_19 = arith.constant 1.000000e+00 : f32
    %32 = vector.broadcast %cst_19 : f32 to vector<12x128xf32>
    %33 = arith.subf %31, %32 : vector<12x128xf32>
    %cst_20 = arith.constant 1.67326319 : f32
    %34 = vector.broadcast %cst_20 : f32 to vector<12x128xf32>
    %35 = arith.mulf %34, %33 : vector<12x128xf32>
    %cst_21 = arith.constant 0.000000e+00 : f32
    %36 = vector.broadcast %cst_21 : f32 to vector<12x128xf32>
    %37 = arith.cmpf ogt, %28, %36 : vector<12x128xf32>
    %38 = arith.select %37, %28, %35 : vector<12x128xi1>, vector<12x128xf32>
    %cst_22 = arith.constant 1.05070102 : f32
    %39 = vector.broadcast %cst_22 : f32 to vector<12x128xf32>
    %40 = arith.mulf %39, %38 : vector<12x128xf32>
    %cst_23 = arith.constant dense<0.000000e+00> : vector<2x128xf32>
    %41 = tpu.matmul %5, %40, %cst_23 {dimension_numbers = #tpu.dot_dimension_numbers<[1], [0], [0], [1], [0, 0, 1, 1], [], []>} : vector<2x12xf32>, vector<12x128xf32>, vector<2x128xf32> -> vector<2x128xf32>
    %42 = vector.broadcast %8 : vector<2x1xf32> to vector<2x128xf32>
    %43 = arith.addf %41, %42 : vector<2x128xf32>
    %44 = vector.extract_strided_slice %43 {offsets = [0, 0], sizes = [1, 128], strides = [1, 1]} : vector<2x128xf32> to vector<1x128xf32>
    %45 = vector.extract_strided_slice %43 {offsets = [1, 0], sizes = [1, 128], strides = [1, 1]} : vector<2x128xf32> to vector<1x128xf32>
    %46 = arith.subf %44, %45 : vector<1x128xf32>
    %47 = arith.maximumf %44, %45 : vector<1x128xf32>
    %48 = math.absf %46 : vector<1x128xf32>
    %cst_24 = arith.constant 0.000000e+00 : f32
    %49 = vector.broadcast %cst_24 : f32 to vector<1x128xf32>
    %50 = arith.subf %49, %48 : vector<1x128xf32>
    %51 = math.exp %50 : vector<1x128xf32>
    %cst_25 = arith.constant 1.000000e+00 : f32
    %52 = vector.broadcast %cst_25 : f32 to vector<1x128xf32>
    %53 = arith.addf %52, %51 : vector<1x128xf32>
    %54 = math.log %53 : vector<1x128xf32>
    %55 = arith.addf %47, %54 : vector<1x128xf32>
    %56 = vector.broadcast %55 : vector<1x128xf32> to vector<2x128xf32>
    %57 = arith.subf %43, %56 : vector<2x128xf32>
    %c0_26 = arith.constant 0 : index
    %c0_27 = arith.constant 0 : index
    %58 = vector.load %arg4[%c0_26, %c0_27] : memref<2x128xf32, #tpu.memory_space<vmem>>, vector<2x128xf32>
    tpu.vector_store %arg4[%c0_26, %c0_27], %57 {strides = array<i32>} : memref<2x128xf32, #tpu.memory_space<vmem>>, vector<2x128xf32>,
    return
  }
  func.func @transform_0(%arg0: i32) -> (i32, i32) {
    %c0_i32 = arith.constant 0 : i32
    %c0_i32_0 = arith.constant 0 : i32
    return %c0_i32, %arg0 : i32, i32
  }
  func.func @transform_1(%arg0: i32) -> (i32, i32) {
    %c0_i32 = arith.constant 0 : i32
    %c0_i32_0 = arith.constant 0 : i32
    return %c0_i32, %arg0 : i32, i32
  }
  func.func @transform_2(%arg0: i32) -> (i32, i32) {
    %c0_i32 = arith.constant 0 : i32
    %c0_i32_0 = arith.constant 0 : i32
    %c0_i32_1 = arith.constant 0 : i32
    return %c0_i32, %c0_i32_0 : i32, i32
  }
  func.func @transform_3(%arg0: i32) -> (i32, i32) {
    %c0_i32 = arith.constant 0 : i32
    %c0_i32_0 = arith.constant 0 : i32
    return %c0_i32, %arg0 : i32, i32
  }
}

</mosaic_0001>

<bundles_post_ra>
// kernel: model00_forward.1
= control target key start
LH: loop header
LB: loop body
LE: loop exit
PB: predicated region body
PF: predicated region fallthrough
CT: control target
= control target key end

     0   :  { %8 = vsyncpa [#allocation3], 0  ;;  %s474_s0 = inlined_call_operand.vmem [shape: f32[16,8], index: 0, kind: input, shape index: {}]   ;;  %s475_s1 = inlined_call_operand.vmem [shape: f32[24,8], index: 1, kind: input, shape index: {}]   ;;  %s476_s2 = inlined_call_operand.hbm [shape: f32[144,128], index: 2, kind: input, shape index: {}]   ;;  %s477_s3 = inlined_call_operand.hbm [shape: f32[2,8], index: 3, kind: output, shape index: {}]  }
   0x1   :  { %9 = vsyncpa [#allocation4], 0  ;;  %s18_s14 = sshll.u32 %s476_s2, 4  ;;  %s420_s15 = smov [#allocation2]   ;;  %s19_s14 = int_to_ptr.hbm [resolvable:$true] %s18_s14 }
   0x2   :  { %s20_s16 = sshll.u32 %s420_s15, 4  ;;  %s421_s17 = smov 128   ;;  %s21_s16 = int_to_ptr.vmem [resolvable:$true] %s20_s16 }
   0x3   :  { %s422_s18 = smov 8  }
   0x4   :  { %26 = dma.hbm_to_vmem [thread:$0]  %s19_s14, 2304, %s21_s16, [#allocation3], %s421_s17, %s421_s17, %s422_s18  }
   0x5   :  { %416 = dma.done.wait [#allocation3], 2304  }
   0x6   :  { %417 = vsyncadd [#allocation3], 4294964992  ;;  %v423_v0 = vmov 0   ;;  %v35_v1 = vld [vmem:[%s475_s1 + $0x10] sm:$0xff]  ;;  %v34_v2 = vld [vmem:[%s475_s1 + $0x8] sm:$0xff]  ;;  %vm54_vm0 = vcmask 195584  }
   0x7   :  { %350 = vset.pattern.permute.xlu1 %v423_v0  ;;  %349 = vset.pattern.permute.xlu0 %v423_v0  ;;  %v32_v3 = vld [vmem:[%s474_s0 + $0x8] sm:$0xff]  ;;  %v31_v4 = vld [vmem:[%s474_s0] sm:$0xff]  ;;  %v50_v6 = vld [vmem:[#allocation2 + $0x70] sm:$0x1]  ;;  %vm96_vm1 = vcmask 130048   ;;  %vm211_vm3 = vcmask 1040384  }
   0x8   :  { %351 = vset.pattern.permute.xlu2 %v423_v0  ;;  %80 = vmatpush.msra.mxu0 %v35_v1  ;;  %v33_v5 = vld [vmem:[%s475_s1] sm:$0xff]  ;;  %v43_v8 = vld [vmem:[#allocation2 + $0x38] sm:$0x1]  ;;  %v49_v11 = vld [vmem:[#allocation2 + $0x68] sm:$0xff]  ;;  %vm204_vm7 = vcmask 203776   ;;  %vm263_vm10 = vcmask 1043456  }
   0x9   :  { %339 = vmatpush.msra.mxu3 %v35_v1  ;;  %123 = vmatpush.msra.mxu1 %v32_v3  ;;  %v40_v7 = vld [vmem:[#allocation2 + $0x20] sm:$0xff]  ;;  %v41_v12 = vld [vmem:[#allocation2 + $0x28] sm:$0xff]  ;;  %v39_v13 = vld [vmem:[#allocation2 + $0x18] sm:$0x1]  ;;  %vm259_vm11 = vcmask 97280   ;;  %s424_s0 = smov [#allocation5]  }
   0xa   :  { %81 = vmatpush.msra.mxu0 %v34_v2  ;;  %v36_v9 = vld [vmem:[#allocation2] sm:$0xff]  ;;  %155 = vperm.xlu0 %349, %v50_v6   ;;  %v37_v14 = vld [vmem:[#allocation2 + $0x8] sm:$0xff]  ;;  %v47_v15 = vld [vmem:[#allocation2 + $0x58] sm:$0xff]  ;;  %s308_s1 = sshll.u32 %s424_s0, 4  ;;  %s310_s30 = sshll.u32 %s477_s3, 4  ;;  %s309_s1 = int_to_ptr.vmem [resolvable:$true] %s308_s1  ;;  %s311_s30 = int_to_ptr.hbm [resolvable:$true] %s310_s30 }
   0xb   :  { %340 = vmatpush.msra.mxu3 %v34_v2  ;;  %124 = vmatpush.msra.mxu1 %v31_v4  ;;  %v48_v10 = vld [vmem:[#allocation2 + $0x60] sm:$0xff]  ;;  %v53_v16 = vld [vmem:[#allocation2 + $0x88] sm:$0x3]  ;;  %v42_v17 = vld [vmem:[#allocation2 + $0x30] sm:$0xff] }
   0xc   :  { %82 = vmatpush.msra.mxu0 %v33_v5  ;;  %324 = vmatmul.msk.f32.vlgmr.msra.gmra.mxu1 %vm96_vm1, %v36_v9  ;;  %v38_v18 = vld [vmem:[#allocation2 + $0x10] sm:$0xff]  ;;  %v52_v45 = vld [vmem:[#allocation2 + $0x80] sm:$0xf]  ;;  %v51_v49 = vld [vmem:[#allocation2 + $0x78] sm:$0xff] }
   0xd   :  { %341 = vmatpush.msra.mxu3 %v33_v5  ;;  %320 = vmatmul.msk.f32.vlgmr.msra.gmra.mxu0 %vm54_vm0, %v40_v7  ;;  %v44_v5 = vld [vmem:[#allocation2 + $0x40] sm:$0xff]  ;;  %v45_v6 = vld [vmem:[#allocation2 + $0x48] sm:$0xf] }
   0xe   :  { %323 = vmatmul.msk.f32.vlgmr.msra.gmra.mxu3 %vm54_vm0, %v43_v8  ;;  %145 = vperm.xlu1 %350, %v48_v10  }
   0xf   :  { %342 = vmatpush.msrb.mxu3 %v32_v3  ;;  %201 = vperm.xlu2 %351, %v52_v45  }
  0x11   :  { %343 = vmatpush.msrb.mxu3 %v31_v4 }
  0x12   :  { %150 = vperm.xlu0 %349, %v49_v11  }
  0x14   :  { %325 = vmatmul.msk.f32.gmra.mxu1 %vm96_vm1, %v37_v14 }
  0x15   :  { %321 = vmatmul.msk.f32.gmra.mxu0 %vm54_vm0, %v41_v12 }
  0x16   :  { %327 = vmatmul.msk.f32.vlgmr.msrb.gmra.mxu3 %vm96_vm1, %v39_v13  ;;  %140 = vperm.xlu1 %350, %v47_v15  }
  0x17   :  { %196 = vperm.xlu2 %351, %v51_v49  }
  0x1a   :  { %256 = vperm.xlu0 %349, %v53_v16  }
  0x1c   :  { %326 = vmatmul.msk.f32.gmra.mxu1 %vm96_vm1, %v38_v18 }
  0x1d   :  { %322 = vmatmul.msk.f32.gmra.mxu0 %vm54_vm0, %v42_v17 }
  0x69   :  { %v202_v7 = vpop.permute.xlu2 %201 }
  0x71   :  { %v197_v8 = vpop.permute.xlu2 %196 }
  0x7c   :  { %v156_v26 = vpop.permute.xlu0 %155 }
  0x80   :  { %v146_v19 = vpop.permute.xlu1 %145 }
  0x84   :  { %v151_v41 = vpop.permute.xlu0 %150 }
  0x88   :  { %v141_v24 = vpop.permute.xlu1 %140 }
  0x89   :  { %v126_v21 = vpop.f32.mrf.mxu1 }
  0x8a   :  { %v84_v20 = vpop.f32.mrf.mxu0 }
  0x8b   :  { %v127_v22 = vadd.f32 %v126_v21, %v84_v20 }
  0x8d   :  { %v158_v28 = vadd.f32 %v141_v24, %v127_v22 }
  0x8f   :  { %v162_v31 = vmin.f32 %v158_v28, 0.0  ;;  %vm182_vm6 = vcmp.gt.f32.partialorder %v158_v28, 0.0 }
  0x91   :  { %v93_v23 = vpop.f32.mrf.mxu3  ;;  %v129_v27 = vpop.f32.mrf.mxu1  ;;  %v166_v39 = vmul.f32 1.442695, %v162_v31 }
  0x92   :  { %v87_v25 = vpop.f32.mrf.mxu0 }
  0x93   :  { %v130_v29 = vadd.f32 %v129_v27, %v87_v25  ;;  %v46_v27 = vld [vmem:[#allocation2 + $0x50] sm:$0x3] }
  0x95   :  { %v159_v30 = vadd.f32 %v146_v19, %v130_v29 }
  0x97   :  { %v163_v32 = vmin.f32 %v159_v30, 0.0  ;;  %vm183_vm5 = vcmp.gt.f32.partialorder %v159_v30, 0.0 }
  0x99   :  { %v135_v33 = vpop.f32.mrf.mxu3  ;;  %v168_v35 = vmul.f32 1.442695, %v163_v32  ;;  %v132_v38 = vpop.f32.mrf.mxu1 }
  0x9a   :  { %v136_v34 = vadd.f32 %v135_v33, %v93_v23  ;;  %v90_v36 = vpop.f32.mrf.mxu0 }
  0x9b   :  { %v133_v40 = vadd.f32 %v132_v38, %v90_v36  ;;  %352 = vpow2.f32 %v168_v35 }
  0x9c   :  { %v161_v37 = vadd.f32 %v156_v26, %v136_v34  ;;  %354 = vpow2.f32 %v166_v39 }
  0x9d   :  { %v160_v43 = vadd.f32 %v151_v41, %v133_v40 }
  0x9e   :  { %v165_v42 = vmin.f32 %v161_v37, 0.0  ;;  %vm185_vm2 = vcmp.gt.f32.partialorder %v161_v37, 0.0 }
  0x9f   :  { %v164_v46 = vmin.f32 %v160_v43, 0.0  ;;  %vm184_vm4 = vcmp.gt.f32.partialorder %v160_v43, 0.0 }
  0xa0   :  { %v172_v44 = vmul.f32 1.442695, %v165_v42 }
  0xa1   :  { %v170_v47 = vmul.f32 1.442695, %v164_v46  ;;  %v353_v48 = vpop.eup %352 }
  0xa2   :  { %356 = vpow2.f32 %v172_v44  ;;  %v355_v50 = vpop.eup %354  ;;  %v329_v52 = vadd.f32 -1.0, %v353_v48 }
  0xa3   :  { %358 = vpow2.f32 %v170_v47  ;;  %v328_v54 = vadd.f32 -1.0, %v355_v50 }
  0xa4   :  { %v179_v58 = vmul.f32 1.6732632, %v329_v52 }
  0xa5   :  { %v178_v62 = vmul.f32 1.6732632, %v328_v54 }
  0xa6   :  { %v187_v0 = vsel %vm183_vm5, %v159_v30, %v179_v58 }
  0xa7   :  { %v186_v2 = vsel %vm182_vm6, %v158_v28, %v178_v62  ;;  %v191_v3 = vmul.f32 1.050701, %v187_v0  ;;  %v257_v28 = vpop.permute.xlu0 %256 }
  0xa8   :  { %v357_v51 = vpop.eup %356  ;;  %v190_v4 = vmul.f32 1.050701, %v186_v2 }
  0xa9   :  { %v331_v53 = vadd.f32 -1.0, %v357_v51  ;;  %v359_v55 = vpop.eup %358 }
  0xaa   :  { %v330_v57 = vadd.f32 -1.0, %v359_v55 }
  0xab   :  { %v181_v56 = vmul.f32 1.6732632, %v331_v53 }
  0xac   :  { %v180_v61 = vmul.f32 1.6732632, %v330_v57 }
  0xad   :  { %v189_v59 = vsel %vm185_vm2, %v161_v37, %v181_v56 }
  0xae   :  { %v193_v60 = vmul.f32 1.050701, %v189_v59  ;;  %v188_v63 = vsel %vm184_vm4, %v160_v43, %v180_v61 }
  0xaf   :  { %v192_v1 = vmul.f32 1.050701, %v188_v63 }
  0xb0   :  { %332 = vmatpush.msk.msra.mxu2 %vm211_vm3, %v193_v60 }
  0xb2   :  { %228 = vmatpush.msra.mxu2 %v192_v1 }
  0xb4   :  { %229 = vmatpush.msra.mxu2 %v191_v3 }
  0xb6   :  { %230 = vmatpush.msra.mxu2 %v190_v4 }
  0xb7   :  { %333 = vmatmul.msk.f32.vlgmr.msra.gmra.mxu2 %vm204_vm7, %v44_v5 }
  0xbf   :  { %334 = vmatmul.msk.f32.gmra.mxu2 %vm204_vm7, %v45_v6 }
 0x13a   :  { %v232_v9 = vpop.f32.mrf.mxu2 }
 0x13b   :  { %v233_v10 = vadd.f32 %v232_v9, %v197_v8 }
 0x13d   :  { %v238_v11 = vmin.f32 %v233_v10, 0.0  ;;  %vm248_vm8 = vcmp.gt.f32.partialorder %v233_v10, 0.0 }
 0x13f   :  { %v240_v12 = vmul.f32 1.442695, %v238_v11 }
 0x141   :  { %360 = vpow2.f32 %v240_v12 }
 0x142   :  { %v235_v13 = vpop.f32.mrf.mxu2 }
 0x143   :  { %v236_v14 = vadd.f32 %v235_v13, %v202_v7 }
 0x145   :  { %v239_v15 = vmin.f32 %v236_v14, 0.0  ;;  %vm249_vm9 = vcmp.gt.f32.partialorder %v236_v14, 0.0 }
 0x147   :  { %v242_v16 = vmul.f32 1.442695, %v239_v15  ;;  %v361_v17 = vpop.eup %360 }
 0x148   :  { %v335_v18 = vadd.f32 -1.0, %v361_v17 }
 0x149   :  { %362 = vpow2.f32 %v242_v16 }
 0x14a   :  { %v246_v20 = vmul.f32 1.6732632, %v335_v18 }
 0x14c   :  { %v250_v24 = vsel %vm248_vm8, %v233_v10, %v246_v20 }
 0x14d   :  { %v252_v26 = vmul.f32 1.050701, %v250_v24 }
 0x14f   :  { %v363_v19 = vpop.eup %362 }
 0x150   :  { %v336_v21 = vadd.f32 -1.0, %v363_v19 }
 0x152   :  { %v247_v22 = vmul.f32 1.6732632, %v336_v21 }
 0x154   :  { %v251_v23 = vsel %vm249_vm9, %v236_v14, %v247_v22 }
 0x155   :  { %v253_v25 = vmul.f32 1.050701, %v251_v23 }
 0x157   :  { %337 = vmatpush.msk.msra.mxu3 %vm263_vm10, %v253_v25 }
 0x159   :  { %282 = vmatpush.msra.mxu3 %v252_v26 }
 0x15a   :  { %338 = vmatmul.msk.f32.vlgmr.msra.gmra.mxu3 %vm259_vm11, %v46_v27 }
 0x1dd   :  { %v284_v29 = vpop.f32.mrf.mxu3 }
 0x1de   :  { %v285_v30 = vadd.f32 %v284_v29, %v257_v28 }
 0x1e0   :  { %v288_v31 = vrot.slane %v285_v30, 1 }
 0x1e2   :  { %v290_v32 = vsub.f32 %v285_v30, %v288_v31  ;;  %v291_v39 = vmax.f32 %v285_v30, %v288_v31 }
 0x1e4   :  { %v292_v33 = vand.u32 2147483647, %v290_v32 }
 0x1e6   :  { %v293_v34 = vsub.f32 0.0, %v292_v33 }
 0x1e8   :  { %v294_v35 = vmul.f32 1.442695, %v293_v34 }
 0x1ea   :  { %364 = vpow2.f32 %v294_v35 }
 0x1f0   :  { %v365_v36 = vpop.eup %364 }
 0x1f1   :  { %v296_v37 = vadd.f32 1.0, %v365_v36 }
 0x1f3   :  { %366 = vlog2.f32 %v296_v37 }
 0x1f9   :  { %v367_v38 = vpop.eup %366 }
 0x1fa   :  { %v298_v40 = vmul.f32 0.6931472, %v367_v38 }
 0x1fc   :  { %v299_v41 = vadd.f32 %v298_v40, %v291_v39 }
 0x1fe   :  { %v300_v42 = vperm.slane %v299_v41, 0 }
 0x200   :  { %v301_v43 = vsub.f32 %v285_v30, %v300_v42 }
 0x202   :  { %302 = vst [vmem:[#allocation5] sm:$0x3] %v301_v43 }
 0x203   :  { %313 = dma.vmem_to_hbm [thread:$0]  %s309_s1, 32, %s311_s30, [#allocation4]  }
 0x204   :  { %418 = dma.done.wait [#allocation4], 32  }
 0x205   :  { %419 = vsyncadd [#allocation4], 4294967264 }
 0x206   :  { %318 = vsyncpa [#allocation3], 1 }
 0x207   :  { %319 = vsyncpa [#allocation4], 1 }

</bundles_post_ra>
